<compile_context>
chip_gen: v5e
topology: v5e:2x2
jax: 0.10.0
libtpu: 0.0.40
codegen_flags: <defaults>
</compile_context>

<pallas_src>
import functools

import jax
import jax.numpy as jnp
from jax.experimental import pallas as pl
from jax.experimental.pallas import tpu as pltpu

GAMMA = 2.0  # module default; the d*d fast path below assumes gamma == 2
EPS = float(jnp.finfo(jnp.float32).eps)  # == torch.finfo(torch.float32).eps


def _focal_loss_kernel(y_pred_ref, y_true_ref, alpha_ref, out_ref,
                       num_ref, den_ref, *, total_rows):
    i = pl.program_id(0)

    @pl.when(i == 0)
    def _init():
        num_ref[0] = 0.0
        den_ref[0] = 0.0

    x = y_pred_ref[...].astype(jnp.float32)        # [TB, C]  (cast in-kernel, VPU slack)
    labels = y_true_ref[...]                        # [TB, 1]  int32
    alpha = alpha_ref[...].astype(jnp.float32)      # [1, C]

    tb, c = x.shape

    # Rows past the real batch (ragged last tile) must not contribute; also sanitize
    # their unspecified padded values before exp.
    row = jax.lax.broadcasted_iota(jnp.int32, (tb, 1), 0)          # [TB, 1]
    row_valid = (i * tb + row) < total_rows                        # [TB, 1] bool
    x = jnp.where(row_valid, x, 0.0)

    # Numerically stable softmax pieces. exp is the only O(TB*C) transcendental.
    m = jnp.max(x, axis=1, keepdims=True)                          # [TB, 1]
    e = jnp.exp(x - m)                                             # [TB, C]
    sum_e = jnp.sum(e, axis=1, keepdims=True)                      # [TB, 1]

    # gather(1, y_true) as a bool one-hot masked reduction, reused for both gathers.
    col = jax.lax.broadcasted_iota(jnp.int32, (tb, c), 1)          # [TB, C]
    onehot = col == labels                                         # [TB, C] bool

    e_t = jnp.sum(jnp.where(onehot, e, 0.0), axis=1, keepdims=True)          # [TB, 1]
    alpha_t = jnp.sum(jnp.where(onehot, alpha, 0.0), axis=1, keepdims=True)  # [TB, 1]

    # gather-then-log / gather-then-normalize: O(TB) divides and logs only.
    p_t = e_t / sum_e + EPS                                        # [TB, 1]
    foc_t = -jnp.log(p_t)                                          # [TB, 1]
    d = 1.0 - p_t
    w = d * d                                                      # gamma == 2 (no pow)

    contrib = jnp.where(row_valid, alpha_t * w * foc_t, 0.0)
    alpha_t = jnp.where(row_valid, alpha_t, 0.0)

    num_ref[0] += jnp.sum(contrib)
    den_ref[0] += jnp.sum(alpha_t)

    @pl.when(i == pl.num_programs(0) - 1)
    def _finalize():
        # mean( (alpha_t / sum(alpha_t) * B) * w * foc_t ) == num / den
        out_ref[0, 0] = num_ref[0] / den_ref[0]


def focal_loss(y_pred, y_true, alpha=None, *, reduction="mean", block_b=512):
    """y_pred: [B, C] (any float dtype), y_true: [B] int, alpha: [C] or None -> f32 scalar.

    block_b: batch tile size (rows per grid step). Keep it such that the per-step
    footprint (~4 * TB*C*4 bytes for double-buffered input + f32 intermediates) fits
    VMEM; shrink on v7x (64 MiB physical), grow on v5e/v6e (128 MiB).
    """
    B, C = y_pred.shape
    if alpha is None:
        # uniform alpha: alpha_t / sum(alpha_t) * B == 1 -> identical to the "no alpha" path
        alpha = jnp.ones((C,), dtype=jnp.float32)

    y_true_col = y_true.astype(jnp.int32).reshape(B, 1)
    alpha_row = alpha.astype(jnp.float32).reshape(1, C)

    # Batch tile: full B if it fits a single block, else a multiple of 8 (sublane rule).
    tb = B if B <= block_b else max(8, (block_b // 8) * 8)
    grid = (pl.cdiv(B, tb),)

    itemsize = jnp.dtype(y_pred.dtype).itemsize
    cost = pl.CostEstimate(
        flops=6 * B * C,
        transcendentals=B * C + 2 * B,     # exp per element; log + divide per row
        bytes_accessed=B * C * itemsize + B * 4 + C * 4 + 4,
    )

    out = pl.pallas_call(
        functools.partial(_focal_loss_kernel, total_rows=B),
        out_shape=jax.ShapeDtypeStruct((1, 1), jnp.float32),
        grid=grid,
        in_specs=[
            pl.BlockSpec((tb, C), lambda i: (i, 0)),   # logits tile (native dtype)
            pl.BlockSpec((tb, 1), lambda i: (i, 0)),   # labels column
            pl.BlockSpec((1, C), lambda i: (0, 0)),    # alpha row (resident)
        ],
        out_specs=pl.BlockSpec(memory_space=pltpu.SMEM),   # (1,1) scalar result
        scratch_shapes=[
            pltpu.SMEM((1,), jnp.float32),   # num = sum(alpha_t * w * foc_t)
            pltpu.SMEM((1,), jnp.float32),   # den = sum(alpha_t)
        ],
        compiler_params=pltpu.CompilerParams(
            dimension_semantics=("arbitrary",),
        ),
        cost_estimate=cost,
    )(y_pred, y_true_col, alpha_row)

    loss = out[0, 0]
    if reduction == "sum":
        loss = loss * jnp.float32(B)
    return loss


def focal_loss_ref(y_pred, y_true, alpha=None, reduction="mean"):
    """Pure-JAX reference mirroring the PyTorch module."""
    y_pred = y_pred.astype(jnp.float32)
    b = y_pred.shape[0]
    p = jax.nn.softmax(y_pred, axis=1) + EPS
    foc = -jnp.log(p)
    foc_t = jnp.take_along_axis(foc, y_true[:, None], axis=1)
    p_t = jnp.take_along_axis(p, y_true[:, None], axis=1)
    weight = (1.0 - p_t) ** GAMMA
    if alpha is not None:
        a_t = alpha.astype(jnp.float32)[y_true][:, None]
        a_t = a_t / jnp.sum(a_t) * b
        weight = a_t * weight
    fl = (weight * foc_t)[:, 0]
    return jnp.mean(fl) if reduction == "mean" else jnp.sum(fl)


if __name__ == "__main__":
    key = jax.random.PRNGKey(0)

    # Case 1: small single-tile problem, f32 logits, per-class alpha (module defaults).
    B, C = 8, 16
    k1, k2, k3 = jax.random.split(key, 3)
    y_pred = jax.random.normal(k1, (B, C), dtype=jnp.float32)
    y_true = jax.random.randint(k2, (B,), 0, C, dtype=jnp.int32)
    alpha = jnp.linspace(0.5, 1.5, C, dtype=jnp.float32)

    loss = focal_loss(y_pred, y_true, alpha)
    jax.block_until_ready(loss)
    ref = focal_loss_ref(y_pred, y_true, alpha)
    assert jnp.allclose(loss, ref, rtol=1e-5, atol=1e-6), (loss, ref)

    # Case 2: multi-tile grid with a ragged last block, bf16 logits, alpha=None.
    B2, C2 = 24, 40
    k4, k5 = jax.random.split(k3)
    y_pred2 = jax.random.normal(k4, (B2, C2), dtype=jnp.float32).astype(jnp.bfloat16)
    y_true2 = jax.random.randint(k5, (B2,), 0, C2, dtype=jnp.int32)

    loss2 = focal_loss(y_pred2, y_true2, alpha=None, block_b=16)
    jax.block_until_ready(loss2)
    ref2 = focal_loss_ref(y_pred2, y_true2, alpha=None)
    assert jnp.allclose(loss2, ref2, rtol=1e-4, atol=1e-5), (loss2, ref2)

    print("KERNEL_OK")
</pallas_src>

<mosaic_0001>
module attributes {stable_mosaic.version = 11 : i64} {
  func.func @_focal_loss_kernel(%arg0: i32, %arg1: memref<8x16xf32, #tpu.memory_space<vmem>>, %arg2: memref<8x1xi32, #tpu.memory_space<vmem>>, %arg3: memref<1x16xf32, #tpu.memory_space<vmem>>, %arg4: memref<1x1xf32, #tpu.memory_space<smem>>, %arg5: memref<1xf32, #tpu.memory_space<smem>>, %arg6: memref<1xf32, #tpu.memory_space<smem>>) attributes {dimension_semantics = [#tpu.dimension_semantics<arbitrary>], iteration_bounds = array<i64: 1>, scalar_prefetch = 0 : i64, scratch_operands = 2 : i64, tpu.core_type = #tpu.core_type<tc>, window_params = [{transform_indices = @transform_0, window_bounds = array<i64: 8, 16>}, {transform_indices = @transform_1, window_bounds = array<i64: 8, 1>}, {pipeline_mode = #tpu.pipeline_mode<synchronous>, transform_indices = @transform_2, window_bounds = array<i64: 1, 16>}, {transform_indices = @transform_3, window_bounds = array<i64: 1, 1>}]} {
    %c0_i32 = arith.constant 0 : i32
    %0 = arith.cmpi eq, %arg0, %c0_i32 : i32
    %1 = arith.extui %0 : i1 to i32
    %c0_i32_0 = arith.constant 0 : i32
    %2 = arith.cmpi ne, %1, %c0_i32_0 : i32
    scf.if %2 {
      %cst_26 = arith.constant 0.000000e+00 : f32
      %c0_27 = arith.constant 0 : index
      %68 = memref.load %arg5[%c0_27] : memref<1xf32, #tpu.memory_space<smem>>
      memref.store %cst_26, %arg5[%c0_27] : memref<1xf32, #tpu.memory_space<smem>>
      %cst_28 = arith.constant 0.000000e+00 : f32
      %c0_29 = arith.constant 0 : index
      %69 = memref.load %arg6[%c0_29] : memref<1xf32, #tpu.memory_space<smem>>
      memref.store %cst_28, %arg6[%c0_29] : memref<1xf32, #tpu.memory_space<smem>>
    } else {
    }
    %c0 = arith.constant 0 : index
    %c0_1 = arith.constant 0 : index
    %3 = vector.load %arg1[%c0, %c0_1] : memref<8x16xf32, #tpu.memory_space<vmem>>, vector<8x16xf32>
    %c0_2 = arith.constant 0 : index
    %c0_3 = arith.constant 0 : index
    %4 = vector.load %arg2[%c0_2, %c0_3] : memref<8x1xi32, #tpu.memory_space<vmem>>, vector<8x1xi32>
    %c0_4 = arith.constant 0 : index
    %c0_5 = arith.constant 0 : index
    %5 = vector.load %arg3[%c0_4, %c0_5] : memref<1x16xf32, #tpu.memory_space<vmem>>, vector<1x16xf32>
    %6 = tpu.iota {dimensions = array<i32: 0>} : vector<8x1xi32>
    %c8_i32 = arith.constant 8 : i32
    %7 = arith.muli %arg0, %c8_i32 : i32
    %8 = vector.broadcast %7 : i32 to vector<8x1xi32>
    %9 = arith.addi %8, %6 : vector<8x1xi32>
    %c8_i32_6 = arith.constant 8 : i32
    %10 = vector.broadcast %c8_i32_6 : i32 to vector<8x1xi32>
    %11 = arith.cmpi slt, %9, %10 : vector<8x1xi32>
    %cst = arith.constant 0.000000e+00 : f32
    %12 = vector.shape_cast %11 : vector<8x1xi1> to vector<8x1xi1>
    %13 = vector.broadcast %12 : vector<8x1xi1> to vector<8x16xi1>
    %14 = vector.broadcast %cst : f32 to vector<8x16xf32>
    %15 = arith.select %13, %3, %14 : vector<8x16xi1>, vector<8x16xf32>
    %cst_7 = arith.constant dense<0xFF800000> : vector<8xf32>
    %16 = vector.multi_reduction <maximumf>, %15, %cst_7 [1] : vector<8x16xf32> to vector<8xf32>
    %17 = vector.shape_cast %16 : vector<8xf32> to vector<8x1xf32>
    %18 = vector.broadcast %17 : vector<8x1xf32> to vector<8x16xf32>
    %19 = arith.subf %15, %18 : vector<8x16xf32>
    %20 = math.exp %19 : vector<8x16xf32>
    %cst_8 = arith.constant dense<0.000000e+00> : vector<8xf32>
    %21 = vector.multi_reduction <add>, %20, %cst_8 [1] : vector<8x16xf32> to vector<8xf32>
    %22 = vector.shape_cast %21 : vector<8xf32> to vector<8x1xf32>
    %23 = tpu.iota {dimensions = array<i32: 1>} : vector<8x16xi32>
    %24 = vector.broadcast %4 : vector<8x1xi32> to vector<8x16xi32>
    %25 = arith.cmpi eq, %23, %24 : vector<8x16xi32>
    %cst_9 = arith.constant 0.000000e+00 : f32
    %26 = vector.broadcast %cst_9 : f32 to vector<8x16xf32>
    %27 = arith.select %25, %20, %26 : vector<8x16xi1>, vector<8x16xf32>
    %cst_10 = arith.constant dense<0.000000e+00> : vector<8xf32>
    %28 = vector.multi_reduction <add>, %27, %cst_10 [1] : vector<8x16xf32> to vector<8xf32>
    %29 = vector.shape_cast %28 : vector<8xf32> to vector<8x1xf32>
    %cst_11 = arith.constant 0.000000e+00 : f32
    %30 = vector.shape_cast %5 : vector<1x16xf32> to vector<1x16xf32>
    %31 = vector.broadcast %30 : vector<1x16xf32> to vector<8x16xf32>
    %32 = vector.broadcast %cst_11 : f32 to vector<8x16xf32>
    %33 = arith.select %25, %31, %32 : vector<8x16xi1>, vector<8x16xf32>
    %cst_12 = arith.constant dense<0.000000e+00> : vector<8xf32>
    %34 = vector.multi_reduction <add>, %33, %cst_12 [1] : vector<8x16xf32> to vector<8xf32>
    %35 = vector.shape_cast %34 : vector<8xf32> to vector<8x1xf32>
    %36 = arith.divf %29, %22 : vector<8x1xf32>
    %cst_13 = arith.constant 1.1920929E-7 : f32
    %37 = vector.broadcast %cst_13 : f32 to vector<8x1xf32>
    %38 = arith.addf %36, %37 : vector<8x1xf32>
    %39 = math.log %38 : vector<8x1xf32>
    %cst_14 = arith.constant 0.000000e+00 : f32
    %40 = vector.broadcast %cst_14 : f32 to vector<8x1xf32>
    %41 = arith.subf %40, %39 : vector<8x1xf32>
    %cst_15 = arith.constant 1.000000e+00 : f32
    %42 = vector.broadcast %cst_15 : f32 to vector<8x1xf32>
    %43 = arith.subf %42, %38 : vector<8x1xf32>
    %44 = arith.mulf %43, %43 : vector<8x1xf32>
    %45 = arith.mulf %35, %44 : vector<8x1xf32>
    %46 = arith.mulf %45, %41 : vector<8x1xf32>
    %cst_16 = arith.constant 0.000000e+00 : f32
    %47 = vector.broadcast %cst_16 : f32 to vector<8x1xf32>
    %48 = arith.select %11, %46, %47 : vector<8x1xi1>, vector<8x1xf32>
    %cst_17 = arith.constant 0.000000e+00 : f32
    %49 = vector.broadcast %cst_17 : f32 to vector<8x1xf32>
    %50 = arith.select %11, %35, %49 : vector<8x1xi1>, vector<8x1xf32>
    %c0_18 = arith.constant 0 : index
    %51 = memref.load %arg5[%c0_18] : memref<1xf32, #tpu.memory_space<smem>>
    %52 = vector.shape_cast %48 : vector<8x1xf32> to vector<1x8x1xf32>
    %cst_19 = arith.constant dense<0.000000e+00> : vector<1xf32>
    %53 = vector.multi_reduction <add>, %52, %cst_19 [1, 2] : vector<1x8x1xf32> to vector<1xf32>
    %54 = vector.shape_cast %53 : vector<1xf32> to vector<1x1x1xf32>
    %55 = vector.extract %54[0, 0, 0] : f32 from vector<1x1x1xf32>
    %56 = arith.addf %51, %55 : f32
    %c0_20 = arith.constant 0 : index
    %57 = memref.load %arg5[%c0_20] : memref<1xf32, #tpu.memory_space<smem>>
    memref.store %56, %arg5[%c0_20] : memref<1xf32, #tpu.memory_space<smem>>
    %c0_21 = arith.constant 0 : index
    %58 = memref.load %arg6[%c0_21] : memref<1xf32, #tpu.memory_space<smem>>
    %59 = vector.shape_cast %50 : vector<8x1xf32> to vector<1x8x1xf32>
    %cst_22 = arith.constant dense<0.000000e+00> : vector<1xf32>
    %60 = vector.multi_reduction <add>, %59, %cst_22 [1, 2] : vector<1x8x1xf32> to vector<1xf32>
    %61 = vector.shape_cast %60 : vector<1xf32> to vector<1x1x1xf32>
    %62 = vector.extract %61[0, 0, 0] : f32 from vector<1x1x1xf32>
    %63 = arith.addf %58, %62 : f32
    %c0_23 = arith.constant 0 : index
    %64 = memref.load %arg6[%c0_23] : memref<1xf32, #tpu.memory_space<smem>>
    memref.store %63, %arg6[%c0_23] : memref<1xf32, #tpu.memory_space<smem>>
    %c0_i32_24 = arith.constant 0 : i32
    %65 = arith.cmpi eq, %arg0, %c0_i32_24 : i32
    %66 = arith.extui %65 : i1 to i32
    %c0_i32_25 = arith.constant 0 : i32
    %67 = arith.cmpi ne, %66, %c0_i32_25 : i32
    scf.if %67 {
      %c0_26 = arith.constant 0 : index
      %68 = memref.load %arg5[%c0_26] : memref<1xf32, #tpu.memory_space<smem>>
      %c0_27 = arith.constant 0 : index
      %69 = memref.load %arg6[%c0_27] : memref<1xf32, #tpu.memory_space<smem>>
      %70 = arith.divf %68, %69 : f32
      %c0_28 = arith.constant 0 : index
      %c0_29 = arith.constant 0 : index
      %71 = memref.load %arg4[%c0_28, %c0_29] : memref<1x1xf32, #tpu.memory_space<smem>>
      memref.store %70, %arg4[%c0_28, %c0_29] : memref<1x1xf32, #tpu.memory_space<smem>>
    } else {
    }
    return
  }
  func.func @transform_0(%arg0: i32) -> (i32, i32) {
    %c0_i32 = arith.constant 0 : i32
    %c0_i32_0 = arith.constant 0 : i32
    return %arg0, %c0_i32 : i32, i32
  }
  func.func @transform_1(%arg0: i32) -> (i32, i32) {
    %c0_i32 = arith.constant 0 : i32
    %c0_i32_0 = arith.constant 0 : i32
    return %arg0, %c0_i32 : i32, i32
  }
  func.func @transform_2(%arg0: i32) -> (i32, i32) {
    %c0_i32 = arith.constant 0 : i32
    %c0_i32_0 = arith.constant 0 : i32
    %c0_i32_1 = arith.constant 0 : i32
    return %c0_i32, %c0_i32_0 : i32, i32
  }
  func.func @transform_3(%arg0: i32) -> (i32, i32) {
    %c0_i32 = arith.constant 0 : i32
    %c0_i32_0 = arith.constant 0 : i32
    %c0_i32_1 = arith.constant 0 : i32
    return %c0_i32, %c0_i32_0 : i32, i32
  }
}

</mosaic_0001>

<bundles_post_ra>
// kernel: tpu_custom_call.1
= control target key start
LH: loop header
LB: loop body
LE: loop exit
PB: predicated region body
PF: predicated region fallthrough
CT: control target
= control target key end

     0   :  { %vm35_vm0 = vcmask 130048   ;;  %v187_v2 = vmov 0   ;;  %s227_s0 = inlined_call_operand.vmem [shape: f32[8,16], index: 0, kind: input, shape index: {}]   ;;  %s228_s1 = inlined_call_operand.vmem [shape: s32[8,1], index: 1, kind: input, shape index: {}]   ;;  %s229_s2 = inlined_call_operand.vmem [shape: f32[1,16], index: 2, kind: input, shape index: {}]   ;;  %s230_s3 = inlined_call_operand.hbm [shape: f32[1,1], index: 3, kind: output, shape index: {}]  }
   0x1   :  { %v23_v0 = vld [vmem:[%s227_s0] sm:$0xff]  ;;  %163 = vset.pattern.permute.xlu0 %v187_v2 }
   0x2   :  { %v36_v1 = vsel %vm35_vm0, %v23_v0, -inf }
   0x3   :  { %8 = vsyncpa [#allocation5], 0  ;;  %37 = vmax.xlane.f32.xlu0 %v36_v1  ;;  %v24_v3 = vld [vmem:[%s228_s1] sm:$0xff]  ;;  %v45_v9 = vlaneseq  ;;  %vm88_vm2 = vcmask 7168   ;;  %s145_s19 = sshll.u32 %s230_s3, 4  ;;  %s188_s22 = smov [#allocation4]   ;;  %s146_s19 = int_to_ptr.hbm [resolvable:$true] %s145_s19 }
   0x4   :  { %v164_v11 = vld [vmem:[%s229_s2] ss:$0 sm:$0xff] }
   0x5   :  { %v46_v10 = vand.u32 127, %v45_v9 }
  0x17   :  { %48 = vperm.xlu0 %163, %v24_v3  }
  0x76   :  { %v38_v4 = vpop.xlane.xlu0 %37 }
  0x77   :  { %v39_v5 = vsub.f32 %v23_v0, %v38_v4 }
  0x79   :  { %v40_v6 = vmul.f32 1.442695, %v39_v5 }
  0x7b   :  { %165 = vpow2.f32 %v40_v6 }
  0x81   :  { %v166_v7 = vpop.eup %165 }
  0x82   :  { %v42_v8 = vsel %vm35_vm0, %v166_v7, 0.0 }
  0x83   :  { %43 = vadd.xlane.f32.xlu1 %v42_v8 }
  0x89   :  { %v49_v12 = vpop.permute.xlu0 %48 }
  0x8a   :  { %vm50_vm1 = vcmp.eq.s32.totalorder %v46_v10, %v49_v12 }
  0x8b   :  { %v51_v13 = vsel %vm50_vm1, %v166_v7, 0.0  ;;  %v58_v14 = vsel %vm50_vm1, %v164_v11, 0.0 }
  0x8c   :  { %v52_v15 = vsel %vm35_vm0, %v51_v13, 0.0  ;;  %v59_v16 = vsel %vm35_vm0, %v58_v14, 0.0 }
  0x8d   :  { %53 = vadd.xlane.f32.xlu1 %v52_v15  ;;  %60 = vadd.xlane.f32.xlu2 %v59_v16 }
  0xf6   :  { %v44_v17 = vpop.xlane.xlu1 %43 }
  0xf7   :  { %167 = vrcp.f32 %v44_v17  ;;  %v73_v22 = vand.u32 2147483648, %v44_v17  ;;  %v71_v25 = vand.u32 2147483647, %v44_v17  ;;  %vm67_vm4 = vweird.f32 %v44_v17 }
  0xf9   :  { %v74_v27 = vor.u32 1.1754944e-38, %v73_v22  ;;  %vm72_vm6 = vcmp.eq.f32.partialorder %v71_v25, 8.507059e+37 }
  0xfd   :  { %v168_v18 = vpop.eup %167 }
  0xfe   :  { %v63_v19 = vmul.f32 %v168_v18, %v44_v17  ;;  %vm68_vm3 = vweird.f32 %v168_v18 }
  0xff   :  { %vm69_vm5 = vmor %vm67_vm4, %vm68_vm3 }
 0x100   :  { %v64_v20 = vsub.f32 1.0, %v63_v19  ;;  %v61_v21 = vpop.xlane.xlu2 %60  ;;  %v54_v30 = vpop.xlane.xlu1 %53 }
 0x101   :  { %v103_v23 = vsel %vm88_vm2, %v61_v21, 0.0 }
 0x102   :  { %v65_v24 = vmul.f32 %v168_v18, %v64_v20  ;;  %104 = vadd.xlane.f32.xlu1 %v103_v23 }
 0x104   :  { %v66_v26 = vadd.f32 %v168_v18, %v65_v24 }
 0x106   :  { %v70_v28 = vsel %vm69_vm5, %v168_v18, %v66_v26 }
 0x107   :  { %v75_v29 = vsel %vm72_vm6, %v74_v27, %v70_v28 }
 0x108   :  { %v76_v31 = vmul.f32 %v75_v29, %v54_v30 }
 0x10a   :  { %v77_v32 = vadd.f32 1.1920929e-07, %v76_v31 }
 0x10c   :  { %169 = vlog2.f32 %v77_v32  ;;  %v81_v33 = vsub.f32 1.0, %v77_v32 }
 0x10e   :  { %v82_v34 = vmul.f32 %v81_v33, %v81_v33 }
 0x110   :  { %v83_v37 = vmul.f32 %v82_v34, %v61_v21 }
 0x112   :  { %v170_v35 = vpop.eup %169 }
 0x113   :  { %v79_v36 = vmul.f32 0.6931472, %v170_v35 }
 0x115   :  { %v80_v38 = vsub.f32 0.0, %v79_v36 }
 0x117   :  { %v84_v39 = vmul.f32 %v83_v37, %v80_v38 }
 0x119   :  { %v89_v40 = vsel %vm88_vm2, %v84_v39, 0.0 }
 0x11a   :  { %90 = vadd.xlane.f32.xlu2 %v89_v40 }
 0x175   :  { %v105_v41 = vpop.xlane.xlu1 %104 }
 0x176   :  { %v106_v42 = vrot.slane %v105_v41, 4 }
 0x178   :  { %v107_v43 = vadd.f32 %v106_v42, %v105_v41 }
 0x17a   :  { %v108_v44 = vrot.slane %v107_v43, 2 }
 0x17c   :  { %v109_v48 = vadd.f32 %v108_v44, %v107_v43 }
 0x17e   :  { %v110_v51 = vrot.slane %v109_v48, 1 }
 0x180   :  { %v111_v54 = vadd.f32 %v110_v51, %v109_v48 }
 0x18d   :  { %v91_v45 = vpop.xlane.xlu2 %90 }
 0x18e   :  { %v92_v46 = vrot.slane %v91_v45, 4 }
 0x190   :  { %v93_v47 = vadd.f32 %v92_v46, %v91_v45 }
 0x192   :  { %v94_v49 = vrot.slane %v93_v47, 2 }
 0x194   :  { %v95_v50 = vadd.f32 %v94_v49, %v93_v47 }
 0x196   :  { %v96_v52 = vrot.slane %v95_v50, 1 }
 0x198   :  { %v97_v53 = vadd.f32 %v96_v52, %v95_v50 }
 0x19a   :  { %155 = vpush %v97_v53 }
 0x19b   :  { %157 = vpush %v111_v54 }
 0x1cb   :  { %s156_s1 = spop %155 }
 0x1cc   :  { %s158_s2 = spop %157 }
 0x1cd   :  { %v121_v55 = vstv %s158_s2 }
 0x1ce   :  { %171 = vrcp.f32 %v121_v55  ;;  %v133_v59 = vand.u32 2147483648, %v121_v55  ;;  %v131_v61 = vand.u32 2147483647, %v121_v55  ;;  %vm127_vm8 = vweird.f32 %v121_v55 }
 0x1d0   :  { %v134_v63 = vor.u32 1.1754944e-38, %v133_v59  ;;  %vm132_vm10 = vcmp.eq.f32.partialorder %v131_v61, 8.507059e+37 }
 0x1d4   :  { %v172_v56 = vpop.eup %171 }
 0x1d5   :  { %v123_v57 = vmul.f32 %v172_v56, %v121_v55  ;;  %vm128_vm7 = vweird.f32 %v172_v56 }
 0x1d6   :  { %vm129_vm9 = vmor %vm127_vm8, %vm128_vm7 }
 0x1d7   :  { %v124_v58 = vsub.f32 1.0, %v123_v57 }
 0x1d9   :  { %v125_v60 = vmul.f32 %v172_v56, %v124_v58 }
 0x1db   :  { %v126_v62 = vadd.f32 %v172_v56, %v125_v60 }
 0x1dd   :  { %v130_v0 = vsel %vm129_vm9, %v172_v56, %v126_v62 }
 0x1de   :  { %v135_v1 = vsel %vm132_vm10, %v134_v63, %v130_v0 }
 0x1df   :  { %159 = vpush %v135_v1 }
 0x210   :  { %s160_s20 = spop %159 }
 0x211   :  { %s137_s21 = smul.f32 %s160_s20, %s156_s1 }
 0x213   :  { %139 = sst [smem:[#allocation4]] %s137_s21 }
 0x214   :  { %148 = dma.smem_to_hbm %s188_s22, 16, %s146_s19, [#allocation5]  }
 0x215   :  { %185 = dma.done.wait [#allocation5], 16  }
 0x216   :  { %186 = vsyncadd [#allocation5], 4294967280 }
 0x217   :  { %153 = sfence }
 0x218   :  { %154 = vsyncpa [#allocation5], 1 }

</bundles_post_ra>
